<compile_context>
chip_gen: v6e
topology: v6e:2x2x1
jax: 0.10.0
libtpu: 0.0.40
codegen_flags: <defaults>
</compile_context>

<pallas_src>
import math

import jax
import jax.numpy as jnp
from jax import lax
from jax.experimental import pallas as pl
from jax.experimental.pallas import tpu as pltpu

_LANES = 128
_SUBLANES = 8
_VREG = _SUBLANES * _LANES          # 1024 f32 elements per vreg
_DEFAULT_TILE_ROWS = 8192           # (8192, 128) f32 = 4 MiB per stream buffer
_NUM_CORES = 2                      # v7x: 2 TCs; harmless (serial) on v5e/v6e


# ---------------------------------------------------------------------------
# Generic streaming per-lane reduction kernel factory.
#   op == "sse":    refs = (a_ref, b_ref, acc_ref);  accumulates (a - b)^2
#   op == "logsum": refs = (a_ref, acc_ref);         accumulates log(a)
# acc_ref is a per-core (8, 128) f32 slab resident across the "arbitrary"
# step axis; the tiny cross-lane reduction happens in the wrapper.
# ---------------------------------------------------------------------------
def _make_stream_kernel(op, tile_rows, steps_per_core, total_rows, need_mask):
    full_blocks = total_rows // tile_rows   # blocks that need no masking

    def kernel(*refs):
        if op == "sse":
            a_ref, b_ref, acc_ref = refs
            v = a_ref[...] - b_ref[...]
            v = v * v
        else:
            a_ref, acc_ref = refs
            v = jnp.log(a_ref[...])

        c = pl.program_id(0)
        s = pl.program_id(1)

        @pl.when(s == 0)
        def _init():
            acc_ref[...] = jnp.zeros_like(acc_ref)

        if not need_mask:
            # Steady state everywhere: pure unmasked VPU accumulate.
            acc_ref[...] += jnp.sum(v.reshape(-1, _SUBLANES, _LANES), axis=0)
        else:
            g = c * steps_per_core + s   # unclamped global block index

            @pl.when(g < full_blocks)
            def _steady():
                acc_ref[...] += jnp.sum(
                    v.reshape(-1, _SUBLANES, _LANES), axis=0)

            @pl.when(g >= full_blocks)
            def _tail():
                # Row-only mask (single iota + compare + select), only for the
                # partial trailing block and any clamped duplicate block
                # (valid <= 0 -> fully masked).  OOB garbage (incl. NaN from
                # log of garbage) is discarded by the select.
                rows = lax.broadcasted_iota(jnp.int32, (tile_rows, _LANES), 0)
                valid = total_rows - g * tile_rows
                vm = jnp.where(rows < valid, v, 0.0)
                acc_ref[...] += jnp.sum(
                    vm.reshape(-1, _SUBLANES, _LANES), axis=0)

    return kernel


# ---------------------------------------------------------------------------
# Streaming reduction driver: arrays are lane-dense (rows, 128) f32 views with
# rows % 8 == 0.  Returns (num_cores, 8, 128) per-lane partial sums.
# ---------------------------------------------------------------------------
def _stream_reduce(op, arrays, tile_rows):
    rows = arrays[0].shape[0]
    tile_rows = max(_SUBLANES, (min(tile_rows, rows) // _SUBLANES) * _SUBLANES)

    total_blocks = pl.cdiv(rows, tile_rows)
    num_cores = _NUM_CORES if total_blocks >= _NUM_CORES else 1
    steps_per_core = pl.cdiv(total_blocks, num_cores)
    last_block = total_blocks - 1
    need_mask = (rows % tile_rows != 0) or (num_cores * steps_per_core > total_blocks)

    kernel = _make_stream_kernel(op, tile_rows, steps_per_core, rows, need_mask)

    def in_map(c, s):
        # Clamp so duplicated grid points (odd block count split across two
        # cores) never DMA out of bounds; their contribution is fully masked.
        return (jnp.minimum(c * steps_per_core + s, last_block), 0)

    n_elems = rows * _LANES
    if op == "sse":
        flops, transcendentals = 3 * n_elems, 0
    else:
        flops, transcendentals = n_elems, n_elems
    bytes_accessed = len(arrays) * n_elems * 4

    # #inputs x 2 pipeline buffers x tile bytes, plus margin for outputs /
    # compiler scratch.  Stays inside v7x's 64 MiB physical VMEM and raises
    # the v5e 16 MiB scoped default when needed.
    stream_bytes = len(arrays) * 2 * tile_rows * _LANES * 4
    vmem_limit = int(min(max(stream_bytes + (16 << 20), 32 << 20), 112 << 20))

    return pl.pallas_call(
        kernel,
        out_shape=jax.ShapeDtypeStruct((num_cores, _SUBLANES, _LANES),
                                       jnp.float32),
        grid=(num_cores, steps_per_core),
        in_specs=[pl.BlockSpec((tile_rows, _LANES), in_map) for _ in arrays],
        out_specs=pl.BlockSpec((None, _SUBLANES, _LANES),
                               lambda c, s: (c, 0, 0)),
        compiler_params=pltpu.CompilerParams(
            dimension_semantics=("parallel", "arbitrary"),
            vmem_limit_bytes=vmem_limit),
        cost_estimate=pl.CostEstimate(
            flops=flops,
            transcendentals=transcendentals,
            bytes_accessed=bytes_accessed),
    )(*arrays)


# ---------------------------------------------------------------------------
# Wrapper glue.
# ---------------------------------------------------------------------------
def _as_list(v):
    return list(v) if isinstance(v, (list, tuple)) else [v]


def _flat_f32(parts):
    flats = [jnp.asarray(p, jnp.float32).reshape(-1) for p in _as_list(parts)]
    return flats[0] if len(flats) == 1 else jnp.concatenate(flats)


def _log_sum(parts, tile_rows):
    """Streamed sum(log(x)) over one (or a list of) likelihood tensor(s)."""
    flat = _flat_f32(parts)
    n = int(flat.shape[0])
    if n == 0:
        return jnp.float32(0.0)
    rem = (-n) % _VREG
    if rem:
        # Latents are small relative to x_hat; pad with 1.0 (log(1) == 0).
        flat = jnp.pad(flat, (0, rem), constant_values=1.0)
    arr = flat.reshape(-1, _LANES)
    return jnp.sum(_stream_reduce("logsum", (arr,), tile_rows))


def rate_distortion_loss(output, target, lmbda=0.01,
                         tile_rows=_DEFAULT_TILE_ROWS):
    """JAX/Pallas equivalent of RateDistortionLoss.forward.

    output: dict with keys:
      'likelihoods': {'y': array or list of arrays, 'z': array or list of arrays}
      'x_hat': array shaped like target (N, C, H, W)
      'jpeg_bpp_loss': scalar
    target: (N, C, H, W) array
    """
    target = jnp.asarray(target, jnp.float32)
    N, C, H, W = target.shape
    num_pixels = N * H * W

    xhat_flat = jnp.asarray(output['x_hat'], jnp.float32).reshape(-1)
    tgt_flat = target.reshape(-1)
    n_img = int(tgt_flat.shape[0])

    # --- SSE over x_hat / target: stream the 1024-aligned bulk through the
    # kernel (free reshape, no whole-tensor pad copy); <1024-element tail in
    # plain JAX.
    n_bulk = (n_img // _VREG) * _VREG
    sse_total = jnp.float32(0.0)
    if n_bulk:
        xhat2d = xhat_flat[:n_bulk].reshape(-1, _LANES)
        tgt2d = tgt_flat[:n_bulk].reshape(-1, _LANES)
        sse_total = sse_total + jnp.sum(
            _stream_reduce("sse", (xhat2d, tgt2d), tile_rows))
    if n_bulk < n_img:
        d = xhat_flat[n_bulk:] - tgt_flat[n_bulk:]
        sse_total = sse_total + jnp.sum(d * d)

    # --- streamed log-likelihood sums for y and z.
    sum_log_y = _log_sum(output['likelihoods']['y'], tile_rows)
    sum_log_z = _log_sum(output['likelihoods']['z'], tile_rows)

    denom = -math.log(2.0) * num_pixels
    y_bpp = sum_log_y / denom
    z_bpp = sum_log_z / denom
    residual_bpp = y_bpp + z_bpp
    bpp = residual_bpp + jnp.asarray(output['jpeg_bpp_loss'], jnp.float32)

    mse = sse_total / (N * C * H * W) * (255.0 ** 2)
    loss = lmbda * mse + bpp

    return {
        'residual_bpp_loss': residual_bpp,
        'bpp_loss': bpp,
        'y_bpp_loss': y_bpp,
        'z_bpp_loss': z_bpp,
        'mse_loss': mse,
        'loss': loss,
    }


# ---------------------------------------------------------------------------
# Pure-JAX reference (mirrors the PyTorch forward) for validation.
# ---------------------------------------------------------------------------
def _reference(output, target, lmbda=0.01):
    N, C, H, W = target.shape
    num_pixels = N * H * W
    denom = -math.log(2.0) * num_pixels
    y_bpp = sum(jnp.sum(jnp.log(a)) for a in _as_list(output['likelihoods']['y'])) / denom
    z_bpp = sum(jnp.sum(jnp.log(a)) for a in _as_list(output['likelihoods']['z'])) / denom
    residual = y_bpp + z_bpp
    bpp = residual + output['jpeg_bpp_loss']
    mse = jnp.mean((output['x_hat'] - target) ** 2) * 255.0 ** 2
    return {
        'residual_bpp_loss': residual,
        'bpp_loss': bpp,
        'y_bpp_loss': y_bpp,
        'z_bpp_loss': z_bpp,
        'mse_loss': mse,
        'loss': lmbda * mse + bpp,
    }


def _check_case(key, shape, y_shape, z_shape, lmbda=0.01,
                tile_rows=_DEFAULT_TILE_ROWS):
    k1, k2, k3, k4 = jax.random.split(key, 4)
    target = jax.random.uniform(k1, shape, dtype=jnp.float32)
    x_hat = jnp.clip(target + 0.05 * jax.random.normal(k2, shape), 0.0, 1.0)
    y_like = jax.random.uniform(k3, y_shape, minval=0.05, maxval=1.0, dtype=jnp.float32)
    z_like = jax.random.uniform(k4, z_shape, minval=0.05, maxval=1.0, dtype=jnp.float32)
    output = {
        'likelihoods': {'y': y_like, 'z': z_like},
        'x_hat': x_hat,
        'jpeg_bpp_loss': jnp.float32(0.25),
    }
    got = rate_distortion_loss(output, target, lmbda=lmbda, tile_rows=tile_rows)
    got = jax.tree_util.tree_map(jax.block_until_ready, got)
    want = _reference(output, target, lmbda=lmbda)
    keys = ('residual_bpp_loss', 'bpp_loss', 'y_bpp_loss', 'z_bpp_loss',
            'mse_loss', 'loss')
    ok = all(bool(jnp.allclose(got[k], want[k], rtol=1e-4, atol=1e-4)) for k in keys)
    return ok, got, want


if __name__ == "__main__":
    key = jax.random.PRNGKey(0)
    ka, kb = jax.random.split(key, 2)

    # Small shapes consistent with the module (single-tile path; the
    # 512-element remainder exercises the plain-JAX tail).
    ok_small, got_s, want_s = _check_case(
        ka, (2, 3, 16, 16), (2, 8, 4, 4), (2, 4, 1, 1))

    # Medium case with a small tile override: exercises the 2-core "parallel"
    # grid, the unmasked steady state, the masked partial trailing block and
    # the fully-masked clamped duplicate block.
    ok_multi, got_m, want_m = _check_case(
        kb, (2, 3, 48, 48), (2, 64, 8, 8), (2, 32, 2, 2), tile_rows=16)

    if ok_small and ok_multi:
        print("KERNEL_OK")
    else:
        print("MISMATCH",
              {"small": (got_s, want_s) if not ok_small else "ok",
               "multi": (got_m, want_m) if not ok_multi else "ok"})
</pallas_src>

<mosaic_0001>
module attributes {stable_mosaic.version = 11 : i64} {
  func.func @kernel(%arg0: i32, %arg1: i32, %arg2: memref<8x128xf32, #tpu.memory_space<vmem>>, %arg3: memref<8x128xf32, #tpu.memory_space<vmem>>, %arg4: memref<1x8x128xf32, #tpu.memory_space<vmem>>) attributes {dimension_semantics = [#tpu.dimension_semantics<parallel>, #tpu.dimension_semantics<arbitrary>], iteration_bounds = array<i64: 1, 1>, scalar_prefetch = 0 : i64, scratch_operands = 0 : i64, tpu.core_type = #tpu.core_type<tc>, window_params = [{transform_indices = @transform_0, window_bounds = array<i64: 8, 128>}, {transform_indices = @transform_1, window_bounds = array<i64: 8, 128>}, {transform_indices = @transform_2, window_bounds = array<i64: 1, 8, 128>}]} {
    %c0 = arith.constant 0 : index
    %c0_0 = arith.constant 0 : index
    %0 = vector.load %arg2[%c0, %c0_0] : memref<8x128xf32, #tpu.memory_space<vmem>>, vector<8x128xf32>
    %c0_1 = arith.constant 0 : index
    %c0_2 = arith.constant 0 : index
    %1 = vector.load %arg3[%c0_1, %c0_2] : memref<8x128xf32, #tpu.memory_space<vmem>>, vector<8x128xf32>
    %2 = arith.subf %0, %1 : vector<8x128xf32>
    %3 = arith.mulf %2, %2 : vector<8x128xf32>
    %c0_i32 = arith.constant 0 : i32
    %4 = arith.cmpi eq, %arg1, %c0_i32 : i32
    %5 = arith.extui %4 : i1 to i32
    %c0_i32_3 = arith.constant 0 : i32
    %6 = arith.cmpi ne, %5, %c0_i32_3 : i32
    scf.if %6 {
      %cst_10 = arith.constant 0.000000e+00 : f32
      %15 = vector.broadcast %cst_10 : f32 to vector<8x128xf32>
      %c0_11 = arith.constant 0 : index
      %c0_12 = arith.constant 0 : index
      %c0_13 = arith.constant 0 : index
      %16 = vector.load %arg4[%c0_11, %c0_12, %c0_13] : memref<1x8x128xf32, #tpu.memory_space<vmem>>, vector<1x8x128xf32>
      %17 = vector.shape_cast %16 : vector<1x8x128xf32> to vector<8x128xf32>
      %18 = vector.shape_cast %15 : vector<8x128xf32> to vector<1x8x128xf32>
      tpu.vector_store %arg4[%c0_11, %c0_12, %c0_13], %18 {strides = array<i32>} : memref<1x8x128xf32, #tpu.memory_space<vmem>>, vector<1x8x128xf32>,
    } else {
    }
    %c0_4 = arith.constant 0 : index
    %c0_5 = arith.constant 0 : index
    %c0_6 = arith.constant 0 : index
    %7 = vector.load %arg4[%c0_4, %c0_5, %c0_6] : memref<1x8x128xf32, #tpu.memory_space<vmem>>, vector<1x8x128xf32>
    %8 = vector.shape_cast %7 : vector<1x8x128xf32> to vector<8x128xf32>
    %9 = vector.shape_cast %3 : vector<8x128xf32> to vector<1x8x128xf32>
    %cst = arith.constant dense<0.000000e+00> : vector<8x128xf32>
    %10 = vector.multi_reduction <add>, %9, %cst [0] : vector<1x8x128xf32> to vector<8x128xf32>
    %11 = arith.addf %8, %10 : vector<8x128xf32>
    %c0_7 = arith.constant 0 : index
    %c0_8 = arith.constant 0 : index
    %c0_9 = arith.constant 0 : index
    %12 = vector.load %arg4[%c0_7, %c0_8, %c0_9] : memref<1x8x128xf32, #tpu.memory_space<vmem>>, vector<1x8x128xf32>
    %13 = vector.shape_cast %12 : vector<1x8x128xf32> to vector<8x128xf32>
    %14 = vector.shape_cast %11 : vector<8x128xf32> to vector<1x8x128xf32>
    tpu.vector_store %arg4[%c0_7, %c0_8, %c0_9], %14 {strides = array<i32>} : memref<1x8x128xf32, #tpu.memory_space<vmem>>, vector<1x8x128xf32>,
    return
  }
  func.func @transform_0(%arg0: i32, %arg1: i32) -> (i32, i32) {
    %c1_i32 = arith.constant 1 : i32
    %0 = arith.muli %arg0, %c1_i32 : i32
    %1 = arith.addi %0, %arg1 : i32
    %c0_i32 = arith.constant 0 : i32
    %2 = arith.minsi %1, %c0_i32 : i32
    %c0_i32_0 = arith.constant 0 : i32
    %c0_i32_1 = arith.constant 0 : i32
    return %2, %c0_i32_0 : i32, i32
  }
  func.func @transform_1(%arg0: i32, %arg1: i32) -> (i32, i32) {
    %c1_i32 = arith.constant 1 : i32
    %0 = arith.muli %arg0, %c1_i32 : i32
    %1 = arith.addi %0, %arg1 : i32
    %c0_i32 = arith.constant 0 : i32
    %2 = arith.minsi %1, %c0_i32 : i32
    %c0_i32_0 = arith.constant 0 : i32
    %c0_i32_1 = arith.constant 0 : i32
    return %2, %c0_i32_0 : i32, i32
  }
  func.func @transform_2(%arg0: i32, %arg1: i32) -> (i32, i32, i32) {
    %c0_i32 = arith.constant 0 : i32
    %c0_i32_0 = arith.constant 0 : i32
    %c0_i32_1 = arith.constant 0 : i32
    return %arg0, %c0_i32, %c0_i32_0 : i32, i32, i32
  }
}

</mosaic_0001>

<bundles_post_ra>
// kernel: tpu_custom_call.1
= control target key start
LH: loop header
LB: loop body
LE: loop exit
PB: predicated region body
PF: predicated region fallthrough
CT: control target
= control target key end

     0   :  { %7 = vsyncpa [#allocation3], 0  ;;  %s182_s0 = inlined_call_operand.hbm [shape: f32[8,128], index: 0, kind: input, shape index: {}]   ;;  %s183_s1 = inlined_call_operand.hbm [shape: f32[8,128], index: 1, kind: input, shape index: {}]   ;;  %s184_s2 = inlined_call_operand.hbm [shape: f32[1,8,128], index: 2, kind: output, shape index: {}]  }
   0x1   :  { %8 = vsyncpa [#allocation6], 0 }
   0x2   :  { %9 = vsyncpa [#allocation4], 0  ;;  %s155_s9 = smov [#allocation2]   ;;  %s156_s11 = smov [#allocation5]  }
   0x3   :  { %s21_s10 = sshll.u32 %s155_s9, 4  ;;  %s36_s12 = sshll.u32 %s156_s11, 4  ;;  %s22_s10 = int_to_ptr.vmem [resolvable:$true] %s21_s10  ;;  %s37_s12 = int_to_ptr.vmem [resolvable:$true] %s36_s12 }
   0x4   :  { %s97_s13 = scalar_lea.vmem %s22_s10, 128  ;;  %p102_p1 = scmp.lt.s32.totalorder %s22_s10, %s22_s10 }
   0x5   :  { %p98_p0 = scmp.ne.s32.totalorder %s22_s10, %s97_s13  ;;  %p103_p2 = scmp.lt.s32.totalorder %s97_s13, %s97_s13 }
   0x7   :  { %p104_p3 = por %p103_p2, %p102_p1 }
   0x9   :  { %p105_p4 = pnand %p104_p3, %p98_p0 }
   0xb   :  { %108 = shalt.err (!%p105_p4)
}
   0xc   :  { %24 = dma.hbm_to_vmem [thread:$0]  %s182_s0, 128, %s22_s10, [#allocation3]  }
   0xd   :  { %s117_s16 = scalar_lea.vmem %s37_s12, 128  ;;  %p122_p6 = scmp.lt.s32.totalorder %s37_s12, %s37_s12 }
   0xe   :  { %p118_p5 = scmp.ne.s32.totalorder %s37_s12, %s117_s16  ;;  %p123_p7 = scmp.lt.s32.totalorder %s117_s16, %s117_s16 }
  0x10   :  { %p124_p8 = por %p123_p7, %p122_p6 }
  0x12   :  { %p125_p9 = pnand %p124_p8, %p118_p5 }
  0x14   :  { %128 = shalt.err (!%p125_p9)
}
  0x15   :  { %39 = dma.hbm_to_vmem [thread:$0]  %s183_s1, 128, %s37_s12, [#allocation6]  }
  0x16   :  { %149 = dma.done.wait [#allocation3], 128  }
  0x17   :  { %150 = vsyncadd [#allocation3], 4294967168 }
  0x18   :  { %151 = dma.done.wait [#allocation6], 128  }
  0x19   :  { %152 = vsyncadd [#allocation6], 4294967168  ;;  %v52_v0 = vld [vmem:[#allocation2] sm:$0xff]  ;;  %v53_v1 = vld [vmem:[#allocation5] sm:$0xff]  ;;  %s157_s19 = smov [#allocation7]  }
  0x1a   :  { %v54_v2 = vsub.f32 %v52_v0, %v53_v1  ;;  %s71_s0 = sshll.u32 %s157_s19, 4  ;;  %s72_s0 = int_to_ptr.vmem [resolvable:$true] %s71_s0 }
  0x1b   :  { %s129_s20 = scalar_lea.vmem %s72_s0, 128  ;;  %p134_p11 = scmp.lt.s32.totalorder %s72_s0, %s72_s0 }
  0x1c   :  { %v55_v3 = vmul.f32 %v54_v2, %v54_v2  ;;  %p130_p10 = scmp.ne.s32.totalorder %s72_s0, %s129_s20  ;;  %p135_p12 = scmp.lt.s32.totalorder %s129_s20, %s129_s20 }
  0x1e   :  { %64 = vst [vmem:[#allocation7] sm:$0xff] %v55_v3  ;;  %p136_p13 = por %p135_p12, %p134_p11 }
  0x20   :  { %p137_p0 = pnand %p136_p13, %p130_p10 }
  0x22   :  { %140 = shalt.err (!%p137_p0)
}
  0x23   :  { %74 = dma.vmem_to_hbm [thread:$0]  %s72_s0, 128, %s184_s2, [#allocation4]  }
  0x24   :  { %153 = dma.done.wait [#allocation4], 128  }
  0x25   :  { %154 = vsyncadd [#allocation4], 4294967168 }
  0x26   :  { %78 = vsyncpa [#allocation3], 1 }
  0x27   :  { %79 = vsyncpa [#allocation6], 1 }
  0x28   :  { %80 = vsyncpa [#allocation4], 1 }

</bundles_post_ra>
